<compile_context>
chip_gen: v6e
topology: v6e:2x2x1
jax: 0.10.0
libtpu: 0.0.40
codegen_flags: <defaults>
</compile_context>

<pallas_src>
import jax
import jax.numpy as jnp
from jax.experimental import pallas as pl
from jax.experimental.pallas import tpu as pltpu

# Module hyperparameters (consistent with the forward pass semantics).
INP_DIM = 32
INNER_DIM = 64
N_ACTIONS = 4

OUT_LANES = 128      # lane-dense padded width used for compute inside kernel
N_OUT_STORE = 8      # narrow output width actually written to HBM (>= N_ACTIONS)
NEG_PAD = -1e30      # pad-lane bias -> exp underflows to exactly 0


def actor_kernel(x_ref, w1_ref, b1_ref, w2_ref, b2_ref, w3_ref, b3_ref, o_ref):
    """Fused 3-layer MLP + softmax over one (TM, features) row tile."""
    mm_dtype = w1_ref.dtype                      # bf16 (default) or f32
    x = x_ref[...].astype(mm_dtype)              # in-kernel cast (free VPU work)

    # Layer 1: Linear + ReLU  (MXU matmul, f32 accumulation; elementwise f32)
    h1 = jnp.dot(x, w1_ref[...], preferred_element_type=jnp.float32) + b1_ref[...]
    h1 = jnp.maximum(h1, 0.0).astype(mm_dtype)

    # Layer 2: Linear + ReLU
    h2 = jnp.dot(h1, w2_ref[...], preferred_element_type=jnp.float32) + b2_ref[...]
    h2 = jnp.maximum(h2, 0.0).astype(mm_dtype)

    # Layer 3: Linear -> lane-dense padded logits (pad lanes get -1e30 bias).
    logits = jnp.dot(h2, w3_ref[...], preferred_element_type=jnp.float32) + b3_ref[...]

    # Numerically stable softmax over the 128-wide padded action axis.
    m = jnp.max(logits, axis=-1, keepdims=True)
    e = jnp.exp(logits - m)
    denom = jnp.sum(e, axis=-1, keepdims=True)
    probs = e * pl.reciprocal(denom, approx=True)

    # Narrow store: only the first N_OUT_STORE lanes go back to HBM.
    o_ref[...] = probs[:, :N_OUT_STORE].astype(o_ref.dtype)


def prepare_params(params, *, use_bf16=True):
    """One-time (per parameter update) prep: pad layer 3 to 128 lanes and cast
    matmul weights to bf16. Hoisted out of the per-forward hot path."""
    w1, b1, w2, b2, w3, b3 = params
    mm_dtype = jnp.bfloat16 if use_bf16 else jnp.float32
    pad_n = OUT_LANES - N_ACTIONS
    w3p = jnp.pad(w3, ((0, 0), (0, pad_n))).astype(mm_dtype)
    b3p = jnp.pad(b3, ((0, 0), (0, pad_n)), constant_values=NEG_PAD)  # stays f32
    return (w1.astype(mm_dtype), b1, w2.astype(mm_dtype), b2, w3p, b3p)


def _round_up(v, m):
    return ((v + m - 1) // m) * m


def actor_forward(x, prepared_params, *, block_m=1024):
    """x: [B, INP_DIM] float32 -> [B, N_ACTIONS] float32 (rows sum to ~1)."""
    w1, b1, w2, b2, w3, b3 = prepared_params
    B = x.shape[0]

    tile = 8
    B_min = _round_up(B, tile)
    if tile < B_min <= block_m:
        # Batch fits in one big tile: split into 2 grid steps instead so the
        # "parallel" grid axis can shard across both v7x TensorCores.
        TM = max(tile, _round_up((B_min + 1) // 2, tile))
    else:
        TM = min(block_m, B_min)
    B_pad = _round_up(B, TM)
    if B_pad != B:
        x = jnp.pad(x, ((0, B_pad - B), (0, 0)))

    grid = (B_pad // TM,)
    row_in = pl.BlockSpec((TM, INP_DIM), lambda i: (i, 0))       # streamed
    row_out = pl.BlockSpec((TM, N_OUT_STORE), lambda i: (i, 0))  # narrow stores
    pinned = lambda shape: pl.BlockSpec(shape, lambda i: (0, 0))  # VMEM-resident

    out = pl.pallas_call(
        actor_kernel,
        out_shape=jax.ShapeDtypeStruct((B_pad, N_OUT_STORE), jnp.float32),
        grid=grid,
        in_specs=[
            row_in,                              # x (f32, cast in kernel)
            pinned((INP_DIM, INNER_DIM)),        # w1 \
            pinned((1, INNER_DIM)),              # b1  |
            pinned((INNER_DIM, INNER_DIM)),      # w2  | weights pinned in VMEM
            pinned((1, INNER_DIM)),              # b2  | across all grid steps
            pinned((INNER_DIM, OUT_LANES)),      # w3 (padded, bf16)
            pinned((1, OUT_LANES)),              # b3 (padded, f32)
        ],
        out_specs=row_out,
        compiler_params=pltpu.CompilerParams(
            dimension_semantics=("parallel",),   # shard batch tiles across TCs
        ),
    )(x, w1, b1, w2, b2, w3, b3)

    # Thin slice of an 8-wide array (cheap) back to the real action count.
    return out[:B, :N_ACTIONS]


def init_params(key):
    """Mirror nn.Linear init: uniform(-1/sqrt(fan_in), +1/sqrt(fan_in))."""
    ks = jax.random.split(key, 6)

    def linear(kw, kb, fan_in, fan_out):
        bound = 1.0 / jnp.sqrt(jnp.float32(fan_in))
        # PyTorch stores weight as [out, in]; we keep [in, out] for x @ W.
        w = jax.random.uniform(kw, (fan_in, fan_out), jnp.float32, -bound, bound)
        b = jax.random.uniform(kb, (1, fan_out), jnp.float32, -bound, bound)
        return w, b

    w1, b1 = linear(ks[0], ks[1], INP_DIM, INNER_DIM)
    w2, b2 = linear(ks[2], ks[3], INNER_DIM, INNER_DIM)
    w3, b3 = linear(ks[4], ks[5], INNER_DIM, N_ACTIONS)
    return (w1, b1, w2, b2, w3, b3)


def actor_ref(x, params):
    """Pure-JAX f32 reference for correctness checking."""
    w1, b1, w2, b2, w3, b3 = params
    h1 = jnp.maximum(x @ w1 + b1, 0.0)
    h2 = jnp.maximum(h1 @ w2 + b2, 0.0)
    logits = h2 @ w3 + b3
    return jax.nn.softmax(logits, axis=-1)


if __name__ == "__main__":
    key = jax.random.PRNGKey(0)
    k_x, k_p, k_big = jax.random.split(key, 3)

    params = init_params(k_p)
    prepared = prepare_params(params)   # pad/cast once, outside the hot path

    # Small demo batch (single grid step, tile shrunk to 8 rows).
    BATCH = 8
    x = jax.random.normal(k_x, (BATCH, INP_DIM), dtype=jnp.float32)
    out = jax.block_until_ready(actor_forward(x, prepared))
    assert out.shape == (BATCH, N_ACTIONS)
    assert bool(jnp.allclose(jnp.sum(out, axis=-1), 1.0, atol=1e-2))
    assert bool(jnp.allclose(out, actor_ref(x, params), atol=5e-2))

    # Larger batch exercising the batch grid axis (2 "parallel" steps of 256
    # rows), which is where launch/DMA overhead is amortized and both v7x
    # TensorCores are used.
    BIG = 512
    xb = jax.random.normal(k_big, (BIG, INP_DIM), dtype=jnp.float32)
    outb = jax.block_until_ready(actor_forward(xb, prepared))
    assert outb.shape == (BIG, N_ACTIONS)
    assert bool(jnp.allclose(jnp.sum(outb, axis=-1), 1.0, atol=1e-2))
    assert bool(jnp.allclose(outb, actor_ref(xb, params), atol=5e-2))

    print("KERNEL_OK")
</pallas_src>

<mosaic_0001>
module attributes {stable_mosaic.version = 11 : i64} {
  func.func @actor_kernel(%arg0: i32, %arg1: memref<8x32xf32, #tpu.memory_space<vmem>>, %arg2: memref<32x64xbf16, #tpu.memory_space<vmem>>, %arg3: memref<1x64xf32, #tpu.memory_space<vmem>>, %arg4: memref<64x64xbf16, #tpu.memory_space<vmem>>, %arg5: memref<1x64xf32, #tpu.memory_space<vmem>>, %arg6: memref<64x128xbf16, #tpu.memory_space<vmem>>, %arg7: memref<1x128xf32, #tpu.memory_space<vmem>>, %arg8: memref<8x8xf32, #tpu.memory_space<vmem>>) attributes {dimension_semantics = [#tpu.dimension_semantics<parallel>], iteration_bounds = array<i64: 1>, scalar_prefetch = 0 : i64, scratch_operands = 0 : i64, tpu.core_type = #tpu.core_type<tc>, window_params = [{transform_indices = @transform_0, window_bounds = array<i64: 8, 32>}, {pipeline_mode = #tpu.pipeline_mode<synchronous>, transform_indices = @transform_1, window_bounds = array<i64: 32, 64>}, {pipeline_mode = #tpu.pipeline_mode<synchronous>, transform_indices = @transform_2, window_bounds = array<i64: 1, 64>}, {pipeline_mode = #tpu.pipeline_mode<synchronous>, transform_indices = @transform_3, window_bounds = array<i64: 64, 64>}, {pipeline_mode = #tpu.pipeline_mode<synchronous>, transform_indices = @transform_4, window_bounds = array<i64: 1, 64>}, {pipeline_mode = #tpu.pipeline_mode<synchronous>, transform_indices = @transform_5, window_bounds = array<i64: 64, 128>}, {pipeline_mode = #tpu.pipeline_mode<synchronous>, transform_indices = @transform_6, window_bounds = array<i64: 1, 128>}, {transform_indices = @transform_7, window_bounds = array<i64: 8, 8>}]} {
    %c0 = arith.constant 0 : index
    %c0_0 = arith.constant 0 : index
    %0 = vector.load %arg1[%c0, %c0_0] : memref<8x32xf32, #tpu.memory_space<vmem>>, vector<8x32xf32>
    %1 = arith.truncf %0 : vector<8x32xf32> to vector<8x32xbf16>
    %c0_1 = arith.constant 0 : index
    %c0_2 = arith.constant 0 : index
    %2 = vector.load %arg2[%c0_1, %c0_2] : memref<32x64xbf16, #tpu.memory_space<vmem>>, vector<32x64xbf16>
    %cst = arith.constant dense<0.000000e+00> : vector<8x64xf32>
    %3 = tpu.matmul %1, %2, %cst {dimension_numbers = #tpu.dot_dimension_numbers<[1], [0], [0], [1], [0, 0, 1, 1], [], []>} : vector<8x32xbf16>, vector<32x64xbf16>, vector<8x64xf32> -> vector<8x64xf32>
    %c0_3 = arith.constant 0 : index
    %c0_4 = arith.constant 0 : index
    %4 = vector.load %arg3[%c0_3, %c0_4] : memref<1x64xf32, #tpu.memory_space<vmem>>, vector<1x64xf32>
    %5 = vector.broadcast %4 : vector<1x64xf32> to vector<8x64xf32>
    %6 = arith.addf %3, %5 : vector<8x64xf32>
    %cst_5 = arith.constant 0.000000e+00 : f32
    %7 = vector.broadcast %cst_5 : f32 to vector<8x64xf32>
    %8 = arith.maximumf %6, %7 : vector<8x64xf32>
    %9 = arith.truncf %8 : vector<8x64xf32> to vector<8x64xbf16>
    %c0_6 = arith.constant 0 : index
    %c0_7 = arith.constant 0 : index
    %10 = vector.load %arg4[%c0_6, %c0_7] : memref<64x64xbf16, #tpu.memory_space<vmem>>, vector<64x64xbf16>
    %cst_8 = arith.constant dense<0.000000e+00> : vector<8x64xf32>
    %11 = tpu.matmul %9, %10, %cst_8 {dimension_numbers = #tpu.dot_dimension_numbers<[1], [0], [0], [1], [0, 0, 1, 1], [], []>} : vector<8x64xbf16>, vector<64x64xbf16>, vector<8x64xf32> -> vector<8x64xf32>
    %c0_9 = arith.constant 0 : index
    %c0_10 = arith.constant 0 : index
    %12 = vector.load %arg5[%c0_9, %c0_10] : memref<1x64xf32, #tpu.memory_space<vmem>>, vector<1x64xf32>
    %13 = vector.broadcast %12 : vector<1x64xf32> to vector<8x64xf32>
    %14 = arith.addf %11, %13 : vector<8x64xf32>
    %cst_11 = arith.constant 0.000000e+00 : f32
    %15 = vector.broadcast %cst_11 : f32 to vector<8x64xf32>
    %16 = arith.maximumf %14, %15 : vector<8x64xf32>
    %17 = arith.truncf %16 : vector<8x64xf32> to vector<8x64xbf16>
    %c0_12 = arith.constant 0 : index
    %c0_13 = arith.constant 0 : index
    %18 = vector.load %arg6[%c0_12, %c0_13] : memref<64x128xbf16, #tpu.memory_space<vmem>>, vector<64x128xbf16>
    %cst_14 = arith.constant dense<0.000000e+00> : vector<8x128xf32>
    %19 = tpu.matmul %17, %18, %cst_14 {dimension_numbers = #tpu.dot_dimension_numbers<[1], [0], [0], [1], [0, 0, 1, 1], [], []>} : vector<8x64xbf16>, vector<64x128xbf16>, vector<8x128xf32> -> vector<8x128xf32>
    %c0_15 = arith.constant 0 : index
    %c0_16 = arith.constant 0 : index
    %20 = vector.load %arg7[%c0_15, %c0_16] : memref<1x128xf32, #tpu.memory_space<vmem>>, vector<1x128xf32>
    %21 = vector.broadcast %20 : vector<1x128xf32> to vector<8x128xf32>
    %22 = arith.addf %19, %21 : vector<8x128xf32>
    %cst_17 = arith.constant dense<0xFF800000> : vector<8xf32>
    %23 = vector.multi_reduction <maximumf>, %22, %cst_17 [1] : vector<8x128xf32> to vector<8xf32>
    %24 = vector.shape_cast %23 : vector<8xf32> to vector<8x1xf32>
    %25 = vector.broadcast %24 : vector<8x1xf32> to vector<8x128xf32>
    %26 = arith.subf %22, %25 : vector<8x128xf32>
    %27 = math.exp %26 : vector<8x128xf32>
    %cst_18 = arith.constant dense<0.000000e+00> : vector<8xf32>
    %28 = vector.multi_reduction <add>, %27, %cst_18 [1] : vector<8x128xf32> to vector<8xf32>
    %29 = vector.shape_cast %28 : vector<8xf32> to vector<8x1xf32>
    %30 = tpu.reciprocal %29 {approx = true} : vector<8x1xf32> -> vector<8x1xf32>
    %31 = vector.broadcast %30 : vector<8x1xf32> to vector<8x128xf32>
    %32 = arith.mulf %27, %31 : vector<8x128xf32>
    %33 = vector.extract_strided_slice %32 {offsets = [0, 0], sizes = [8, 8], strides = [1, 1]} : vector<8x128xf32> to vector<8x8xf32>
    %c0_19 = arith.constant 0 : index
    %c0_20 = arith.constant 0 : index
    %34 = vector.load %arg8[%c0_19, %c0_20] : memref<8x8xf32, #tpu.memory_space<vmem>>, vector<8x8xf32>
    tpu.vector_store %arg8[%c0_19, %c0_20], %33 {strides = array<i32>} : memref<8x8xf32, #tpu.memory_space<vmem>>, vector<8x8xf32>,
    return
  }
  func.func @transform_0(%arg0: i32) -> (i32, i32) {
    %c0_i32 = arith.constant 0 : i32
    %c0_i32_0 = arith.constant 0 : i32
    return %arg0, %c0_i32 : i32, i32
  }
  func.func @transform_1(%arg0: i32) -> (i32, i32) {
    %c0_i32 = arith.constant 0 : i32
    %c0_i32_0 = arith.constant 0 : i32
    %c0_i32_1 = arith.constant 0 : i32
    return %c0_i32, %c0_i32_0 : i32, i32
  }
  func.func @transform_2(%arg0: i32) -> (i32, i32) {
    %c0_i32 = arith.constant 0 : i32
    %c0_i32_0 = arith.constant 0 : i32
    %c0_i32_1 = arith.constant 0 : i32
    return %c0_i32, %c0_i32_0 : i32, i32
  }
  func.func @transform_3(%arg0: i32) -> (i32, i32) {
    %c0_i32 = arith.constant 0 : i32
    %c0_i32_0 = arith.constant 0 : i32
    %c0_i32_1 = arith.constant 0 : i32
    return %c0_i32, %c0_i32_0 : i32, i32
  }
  func.func @transform_4(%arg0: i32) -> (i32, i32) {
    %c0_i32 = arith.constant 0 : i32
    %c0_i32_0 = arith.constant 0 : i32
    %c0_i32_1 = arith.constant 0 : i32
    return %c0_i32, %c0_i32_0 : i32, i32
  }
  func.func @transform_5(%arg0: i32) -> (i32, i32) {
    %c0_i32 = arith.constant 0 : i32
    %c0_i32_0 = arith.constant 0 : i32
    %c0_i32_1 = arith.constant 0 : i32
    return %c0_i32, %c0_i32_0 : i32, i32
  }
  func.func @transform_6(%arg0: i32) -> (i32, i32) {
    %c0_i32 = arith.constant 0 : i32
    %c0_i32_0 = arith.constant 0 : i32
    %c0_i32_1 = arith.constant 0 : i32
    return %c0_i32, %c0_i32_0 : i32, i32
  }
  func.func @transform_7(%arg0: i32) -> (i32, i32) {
    %c0_i32 = arith.constant 0 : i32
    %c0_i32_0 = arith.constant 0 : i32
    return %arg0, %c0_i32 : i32, i32
  }
}

</mosaic_0001>

<bundles_post_ra>
// kernel: tpu_custom_call.1
= control target key start
LH: loop header
LB: loop body
LE: loop exit
PB: predicated region body
PF: predicated region fallthrough
CT: control target
= control target key end

     0   :  { %12 = vsyncpa [#allocation3], 0  ;;  %s626_s0 = inlined_call_operand.hbm [shape: f32[8,32], index: 0, kind: input, shape index: {}]   ;;  %s627_s1 = inlined_call_operand.hbm [shape: bf16[32,64], index: 1, kind: input, shape index: {}]   ;;  %s628_s2 = inlined_call_operand.vmem [shape: f32[1,64], index: 2, kind: input, shape index: {}]   ;;  %s629_s3 = inlined_call_operand.hbm [shape: bf16[64,64], index: 3, kind: input, shape index: {}]   ;;  %s630_s4 = inlined_call_operand.vmem [shape: f32[1,64], index: 4, kind: input, shape index: {}]   ;;  %s631_s5 = inlined_call_operand.hbm [shape: bf16[64,128], index: 5, kind: input, shape index: {}]   ;;  %s632_s6 = inlined_call_operand.vmem [shape: f32[1,128], index: 6, kind: input, shape index: {}]   ;;  %s633_s7 = inlined_call_operand.hbm [shape: f32[8,8], index: 7, kind: output, shape index: {}]  }
   0x1   :  { %13 = vsyncpa [#allocation6], 0 }
   0x2   :  { %14 = vsyncpa [#allocation9], 0 }
   0x3   :  { %15 = vsyncpa [#allocation4], 0  ;;  %s539_s24 = smov [#allocation5]  }
   0x4   :  { %s31_s25 = sshll.u32 %s539_s24, 4  ;;  %s32_s25 = int_to_ptr.vmem [resolvable:$true] %s31_s25 }
   0x5   :  { %s439_s26 = scalar_lea.vmem %s32_s25, 256  ;;  %p444_p1 = scmp.lt.s32.totalorder %s32_s25, %s32_s25 }
   0x6   :  { %p440_p0 = scmp.ne.s32.totalorder %s32_s25, %s439_s26  ;;  %p445_p2 = scmp.lt.s32.totalorder %s439_s26, %s439_s26 }
   0x8   :  { %p446_p3 = por %p445_p2, %p444_p1 }
   0xa   :  { %p447_p4 = pnand %p446_p3, %p440_p0 }
   0xc   :  { %450 = shalt.err (!%p447_p4)
}
   0xd   :  { %s540_s27 = smov 64   ;;  %s541_s28 = smov 4  }
   0xe   :  { %37 = dma.hbm_to_vmem [thread:$0]  %s627_s1, 256, %s32_s25, [#allocation6], %s540_s27, %s540_s27, %s541_s28  }
   0xf   :  { %s542_s8 = smov [#allocation2]   ;;  %s543_s10 = smov [#allocation7]  }
  0x10   :  { %s22_s9 = sshll.u32 %s542_s8, 4  ;;  %s45_s11 = sshll.u32 %s543_s10, 4  ;;  %s23_s9 = int_to_ptr.vmem [resolvable:$true] %s22_s9  ;;  %s46_s11 = int_to_ptr.vmem [resolvable:$true] %s45_s11 }
  0x11   :  { %s459_s12 = scalar_lea.vmem %s23_s9, 128  ;;  %p464_p6 = scmp.lt.s32.totalorder %s23_s9, %s23_s9 }
  0x12   :  { %p460_p5 = scmp.ne.s32.totalorder %s23_s9, %s459_s12  ;;  %p465_p7 = scmp.lt.s32.totalorder %s459_s12, %s459_s12 }
  0x14   :  { %p466_p8 = por %p465_p7, %p464_p6 }
  0x16   :  { %p467_p9 = pnand %p466_p8, %p460_p5 }
  0x18   :  { %470 = shalt.err (!%p467_p9)
}
  0x19   :  { %25 = dma.hbm_to_vmem [thread:$0]  %s626_s0, 128, %s23_s9, [#allocation3]  }
  0x1a   :  { %s479_s15 = scalar_lea.vmem %s46_s11, 512  ;;  %p484_p11 = scmp.lt.s32.totalorder %s46_s11, %s46_s11 }
  0x1b   :  { %p480_p10 = scmp.ne.s32.totalorder %s46_s11, %s479_s15  ;;  %p485_p12 = scmp.lt.s32.totalorder %s479_s15, %s479_s15 }
  0x1d   :  { %p486_p13 = por %p485_p12, %p484_p11 }
  0x1f   :  { %p487_p0 = pnand %p486_p13, %p480_p10 }
  0x21   :  { %490 = shalt.err (!%p487_p0)
}
  0x22   :  { %51 = dma.hbm_to_vmem [thread:$0]  %s629_s3, 512, %s46_s11, [#allocation6], %s540_s27, %s540_s27, %s541_s28  }
  0x23   :  { %s544_s17 = smov [#allocation8]  }
  0x24   :  { %s59_s18 = sshll.u32 %s544_s17, 4  ;;  %s60_s18 = int_to_ptr.vmem [resolvable:$true] %s59_s18 }
  0x25   :  { %s499_s19 = scalar_lea.vmem %s60_s18, 512  ;;  %p504_p2 = scmp.lt.s32.totalorder %s60_s18, %s60_s18 }
  0x26   :  { %p500_p1 = scmp.ne.s32.totalorder %s60_s18, %s499_s19  ;;  %p505_p3 = scmp.lt.s32.totalorder %s499_s19, %s499_s19 }
  0x28   :  { %p506_p4 = por %p505_p3, %p504_p2 }
  0x2a   :  { %p507_p5 = pnand %p506_p4, %p500_p1 }
  0x2c   :  { %510 = shalt.err (!%p507_p5)
}
  0x2d   :  { %65 = dma.hbm_to_vmem [thread:$0]  %s631_s5, 512, %s60_s18, [#allocation9], %s540_s27, %s540_s27, %s541_s28  }
  0x2e   :  { %531 = dma.done.wait [#allocation3], 128  }
  0x2f   :  { %532 = vsyncadd [#allocation3], 4294967168 }
  0x30   :  { %533 = dma.done.wait [#allocation6], 768  }
  0x31   :  { %534 = vsyncadd [#allocation6], 4294966528 }
  0x32   :  { %535 = dma.done.wait [#allocation9], 512  }
  0x33   :  { %536 = vsyncadd [#allocation9], 4294966784  ;;  %v545_v0 = vmov 0.0   ;;  %vm546_vm0 = vmmov 0   ;;  %v417_v1 = vld [vmem:[#allocation5 + $0x8] sm:$0xff]   ;;  %v418_v2 = vld [vmem:[#allocation5] sm:$0xff]  }
  0x34   :  { %376 = vmatprep.subr.bf16.mxu0 %v545_v0  ;;  %380 = vmatprep.mubr.msk.bf16.mxu0 %vm546_vm0, %v545_v0  ;;  %v81_v3 = vld [vmem:[#allocation2] sm:$0xff]  ;;  %v419_v4 = vld [vmem:[#allocation7 + $0x18] sm:$0xff]   ;;  %vm106_vm1 = vcmask 261120   ;;  %v420_v5 = vld [vmem:[#allocation7 + $0x10] sm:$0xff]   ;;  %vm191_vm2 = vcmask 523264   ;;  %vm328_vm3 = vcmask 64512  }
  0x35   :  { %384 = vmatprep.subr.bf16.mxu1 %v545_v0  ;;  %392 = vmatprep.mubr.msk.bf16.mxu1 %vm546_vm0, %v545_v0  ;;  %v82_v6 = vpack.c.bf16 %v81_v3, %v81_v3  ;;  %v421_v7 = vld [vmem:[#allocation7 + $0x8] sm:$0xff]   ;;  %v422_v8 = vld [vmem:[#allocation7] sm:$0xff]   ;;  %v423_v9 = vld [vmem:[#allocation8 + $0x18] sm:$0xff]  }
  0x36   :  { %377 = vmatpush3.bf16.msra.mxu0 %v417_v1  ;;  %385 = vmatpush3.bf16.msra.mxu1 %v419_v4  ;;  %v424_v10 = vld [vmem:[#allocation8 + $0x10] sm:$0xff]   ;;  %v347_v11 = vld [vmem:[%s628_s2] ss:$0 sm:$0xff]  ;;  %v426_v20 = vld [vmem:[#allocation8] sm:$0xff]  }
  0x37   :  { %378 = vmatprep.subr.bf16.mxu0 %v545_v0  ;;  %386 = vmatprep.subr.bf16.mxu1 %v545_v0  ;;  %v425_v19 = vld [vmem:[#allocation8 + $0x8] sm:$0xff]  }
  0x38   :  { %v351_v21 = vld [vmem:[%s630_s4] ss:$0 sm:$0xff]  ;;  %s547_s4 = smov [#allocation10]  }
  0x39   :  { %v357_v29 = vld [vmem:[%s632_s6] ss:$0 sm:$0xff]  ;;  %s336_s24 = sshll.u32 %s547_s4, 4  ;;  %s337_s24 = int_to_ptr.vmem [resolvable:$true] %s336_s24 }
  0x3a   :  { %379 = vmatpush3.bf16.msra.mxu0 %v418_v2  ;;  %387 = vmatpush3.bf16.msra.mxu1 %v420_v5  ;;  %s511_s6 = scalar_lea.vmem %s337_s24, 128  ;;  %p516_p7 = scmp.lt.s32.totalorder %s337_s24, %s337_s24 }
  0x3b   :  { %396 = vmatprep.subr.bf16.mxu0 %v545_v0  ;;  %388 = vmatprep.subr.bf16.mxu1 %v545_v0  ;;  %p512_p6 = scmp.ne.s32.totalorder %s337_s24, %s511_s6  ;;  %p517_p8 = scmp.lt.s32.totalorder %s511_s6, %s511_s6 }
  0x3d   :  { %381 = vmatmul.mubr.msk.bf16.vlgmr.msra.gmra.mxu0 %vm106_vm1, %v82_v6  ;;  %p518_p9 = por %p517_p8, %p516_p7 }
  0x3e   :  { %404 = vmatprep.mubr.msk.bf16.mxu0 %vm546_vm0, %v545_v0  ;;  %389 = vmatpush3.bf16.msra.mxu1 %v421_v7 }
  0x3f   :  { %390 = vmatprep.subr.bf16.mxu1 %v545_v0  ;;  %397 = vmatpush3.bf16.msra.mxu0 %v423_v9  ;;  %p519_p10 = pnand %p518_p9, %p512_p6 }
  0x40   :  { %398 = vmatprep.subr.bf16.mxu0 %v545_v0 }
  0x42   :  { %391 = vmatpush3.bf16.msra.mxu1 %v422_v8 }
  0x43   :  { %399 = vmatpush3.bf16.msra.mxu0 %v424_v10 }
  0x44   :  { %400 = vmatprep.subr.bf16.mxu0 %v545_v0 }
  0x47   :  { %401 = vmatpush3.bf16.msra.mxu0 %v425_v19 }
  0x48   :  { %402 = vmatprep.subr.bf16.mxu0 %v545_v0 }
  0x4b   :  { %403 = vmatpush3.bf16.msra.mxu0 %v426_v20 }
  0xfd   :  { %v144_v12 = vpop.f32.mrf.mxu0 }
  0xfe   :  { %v145_v13 = vadd.f32 %v347_v11, %v144_v12 }
  0xff   :  { %v382_v14 = vpop.f32.mrf.mxu0 }
 0x100   :  { %v150_v15 = vmax.f32 %v145_v13, 0.0 }
 0x101   :  { %v147_v16 = vpop.f32.mrf.mxu0 }
 0x102   :  { %v151_v17 = vpack.c.bf16 %v150_v15, %v150_v15 }
 0x103   :  { %v383_v18 = vpop.f32.mrf.mxu0 }
 0x104   :  { %393 = vmatmul.mubr.msk.bf16.vlgmr.msra.gmra.mxu1 %vm191_vm2, %v151_v17 }
 0x1c4   :  { %v229_v22 = vpop.f32.mrf.mxu1 }
 0x1c5   :  { %v230_v23 = vadd.f32 %v351_v21, %v229_v22 }
 0x1c6   :  { %v394_v24 = vpop.f32.mrf.mxu1 }
 0x1c7   :  { %v235_v25 = vmax.f32 %v230_v23, 0.0 }
 0x1c8   :  { %v232_v26 = vpop.f32.mrf.mxu1 }
 0x1c9   :  { %v236_v27 = vpack.c.bf16 %v235_v25, %v235_v25 }
 0x1ca   :  { %v395_v28 = vpop.f32.mrf.mxu1 }
 0x1cb   :  { %405 = vmatmul.mubr.msk.bf16.vlgmr.msra.gmra.mxu0 %vm191_vm2, %v236_v27 }
 0x28b   :  { %v313_v30 = vpop.f32.mrf.mxu0 }
 0x28c   :  { %v314_v31 = vadd.f32 %v357_v29, %v313_v30 }
 0x28d   :  { %v406_v32 = vpop.f32.mrf.mxu0 }
 0x28e   :  { %319 = vmax.xlane.f32.xlu0 %v314_v31 }
 0x28f   :  { %v316_v33 = vpop.f32.mrf.mxu0 }
 0x291   :  { %v407_v34 = vpop.f32.mrf.mxu0 }
 0x317   :  { %v320_v35 = vpop.xlane.xlu0 %319 }
 0x318   :  { %v321_v36 = vsub.f32 %v314_v31, %v320_v35 }
 0x31a   :  { %v322_v37 = vmul.f32 1.442695, %v321_v36 }
 0x31c   :  { %427 = vpow2.f32 %v322_v37 }
 0x329   :  { %v428_v38 = vpop.eup %427 }
 0x32a   :  { %324 = vadd.xlane.f32.xlu0 %v428_v38 }
 0x3b3   :  { %v325_v39 = vpop.xlane.xlu0 %324 }
 0x3b4   :  { %429 = vrcp.f32 %v325_v39 }
 0x3c1   :  { %v430_v40 = vpop.eup %429 }
 0x3c2   :  { %v327_v41 = vmul.f32 %v430_v40, %v428_v38 }
 0x3c4   :  { %329 = vst.msk [vmem:[#allocation10] sm:$0xff] %vm328_vm3, %v327_v41 }
 0x3c5   :  { %522 = shalt.err (!%p519_p10)
}
 0x3c6   :  { %339 = dma.vmem_to_hbm [thread:$0]  %s337_s24, 128, %s633_s7, [#allocation4]  }
 0x3c7   :  { %537 = dma.done.wait [#allocation4], 128  }
 0x3c8   :  { %538 = vsyncadd [#allocation4], 4294967168 }
 0x3c9   :  { %343 = vsyncpa [#allocation3], 1 }
 0x3ca   :  { %344 = vsyncpa [#allocation6], 1 }
 0x3cb   :  { %345 = vsyncpa [#allocation9], 1 }
 0x3cc   :  { %346 = vsyncpa [#allocation4], 1 }

</bundles_post_ra>
